<compile_context>
chip_gen: v5e
topology: v5e:2x2
jax: 0.10.0
libtpu: 0.0.40
codegen_flags: <defaults>
</compile_context>

<pallas_src>
import functools

import jax
import jax.numpy as jnp
from jax.experimental import pallas as pl
from jax.experimental.pallas import tpu as pltpu


# ---------------------------------------------------------------------------
# Kernel
# ---------------------------------------------------------------------------
def _ffn_kernel(x_ref, w1_ref, b1_ref, w2_ref, b2_ref, g_ref, beta_ref,
                o_ref, *, eps):
    # x_ref:  (TM, D)      row tile of flattened tokens
    # w1_ref: (D, F)       W1^T   (resident across grid steps)
    # b1_ref: (1, F)
    # w2_ref: (F, D)       W2^T   (resident across grid steps)
    # b2_ref: (1, D)
    # g_ref / beta_ref: (1, D)  LayerNorm affine params
    # o_ref:  (TM, D)
    x = x_ref[...]

    # --- position-wise feed-forward (MXU matmuls, f32 accumulation) ---
    h = jnp.dot(x, w1_ref[...], preferred_element_type=jnp.float32) + b1_ref[...]
    h = jnp.maximum(h, 0.0)                                   # ReLU (VPU)
    y = jnp.dot(h, w2_ref[...], preferred_element_type=jnp.float32) + b2_ref[...]

    # dropout: identity in eval mode.

    # --- residual + LayerNorm over d_model ---
    y = y + x
    mean = jnp.mean(y, axis=-1, keepdims=True)                # XLU lane reduce
    centered = y - mean
    var = jnp.mean(centered * centered, axis=-1, keepdims=True)
    inv = jax.lax.rsqrt(var + eps)                            # EUP rsqrt
    o_ref[...] = (centered * inv) * g_ref[...] + beta_ref[...]


# ---------------------------------------------------------------------------
# Wrapper
# ---------------------------------------------------------------------------
def _round_up(n, m):
    return ((n + m - 1) // m) * m


@functools.partial(jax.jit, static_argnames=("eps", "block_rows"))
def positionwise_ffn(x, params, *, eps=1e-5, block_rows=512):
    """x: (..., d_model) -> (..., d_model). Matches PyTorch forward (eval mode)."""
    orig_shape = x.shape
    d_model = orig_shape[-1]
    d_ff = params["w1"].shape[0]

    x2 = x.reshape(-1, d_model).astype(jnp.float32)           # (N, D)
    n_rows = x2.shape[0]

    # Row tile: multiple of 8 (sublane), capped by the (padded) row count.
    tm = min(_round_up(block_rows, 8), _round_up(n_rows, 8))
    n_pad = _round_up(n_rows, tm)
    if n_pad != n_rows:
        x2 = jnp.pad(x2, ((0, n_pad - n_rows), (0, 0)))

    # Pre-transpose weights once in XLA so the kernel does plain row-major dots.
    w1t = params["w1"].T.astype(jnp.float32)                   # (D, F)
    w2t = params["w2"].T.astype(jnp.float32)                   # (F, D)
    b1 = params["b1"].reshape(1, d_ff).astype(jnp.float32)
    b2 = params["b2"].reshape(1, d_model).astype(jnp.float32)
    gamma = params["gamma"].reshape(1, d_model).astype(jnp.float32)
    beta = params["beta"].reshape(1, d_model).astype(jnp.float32)

    grid = (n_pad // tm,)

    out = pl.pallas_call(
        functools.partial(_ffn_kernel, eps=eps),
        out_shape=jax.ShapeDtypeStruct((n_pad, d_model), jnp.float32),
        grid_spec=pltpu.PrefetchScalarGridSpec(
            num_scalar_prefetch=0,
            grid=grid,
            in_specs=[
                pl.BlockSpec((tm, d_model), lambda i: (i, 0)),      # x tile
                pl.BlockSpec((d_model, d_ff), lambda i: (0, 0)),    # W1^T (resident)
                pl.BlockSpec((1, d_ff), lambda i: (0, 0)),          # b1
                pl.BlockSpec((d_ff, d_model), lambda i: (0, 0)),    # W2^T (resident)
                pl.BlockSpec((1, d_model), lambda i: (0, 0)),       # b2
                pl.BlockSpec((1, d_model), lambda i: (0, 0)),       # gamma
                pl.BlockSpec((1, d_model), lambda i: (0, 0)),       # beta
            ],
            out_specs=pl.BlockSpec((tm, d_model), lambda i: (i, 0)),
        ),
        compiler_params=pltpu.CompilerParams(
            dimension_semantics=("parallel",),
            vmem_limit_bytes=96 * 1024 * 1024,
        ),
    )(x2, w1t, b1, w2t, b2, gamma, beta)

    return out[:n_rows].reshape(orig_shape)


# ---------------------------------------------------------------------------
# Pure-JAX reference (PyTorch semantics, eval mode)
# ---------------------------------------------------------------------------
def positionwise_ffn_reference(x, params, eps=1e-5):
    h = jnp.maximum(x @ params["w1"].T + params["b1"], 0.0)
    y = h @ params["w2"].T + params["b2"]
    y = y + x
    mean = y.mean(-1, keepdims=True)
    var = ((y - mean) ** 2).mean(-1, keepdims=True)
    return (y - mean) / jnp.sqrt(var + eps) * params["gamma"] + params["beta"]


if __name__ == "__main__":
    key = jax.random.PRNGKey(0)
    B, S, D_MODEL, D_FF = 2, 8, 32, 64                         # small demo shapes
    k_x, k_w1, k_b1, k_w2, k_b2 = jax.random.split(key, 5)

    x = jax.random.normal(k_x, (B, S, D_MODEL), dtype=jnp.float32)
    params = {
        "w1": jax.random.normal(k_w1, (D_FF, D_MODEL), dtype=jnp.float32) * 0.1,
        "b1": jax.random.normal(k_b1, (D_FF,), dtype=jnp.float32) * 0.1,
        "w2": jax.random.normal(k_w2, (D_MODEL, D_FF), dtype=jnp.float32) * 0.1,
        "b2": jax.random.normal(k_b2, (D_MODEL,), dtype=jnp.float32) * 0.1,
        "gamma": jnp.ones((D_MODEL,), dtype=jnp.float32),
        "beta": jnp.zeros((D_MODEL,), dtype=jnp.float32),
    }

    # block_rows=8 so the tiny demo still exercises a multi-step grid (grid=(2,)).
    out = positionwise_ffn(x, params, block_rows=8)
    out = jax.block_until_ready(out)
    ref = positionwise_ffn_reference(x, params)

    assert out.shape == x.shape, out.shape
    if jnp.allclose(out, ref, atol=1e-5, rtol=1e-5):
        print("KERNEL_OK")
    else:
        print("MISMATCH", float(jnp.max(jnp.abs(out - ref))))
</pallas_src>

<mosaic_0001>
module attributes {stable_mosaic.version = 11 : i64} {
  func.func @_ffn_kernel(%arg0: i32, %arg1: memref<8x32xf32, #tpu.memory_space<vmem>>, %arg2: memref<32x64xf32, #tpu.memory_space<vmem>>, %arg3: memref<1x64xf32, #tpu.memory_space<vmem>>, %arg4: memref<64x32xf32, #tpu.memory_space<vmem>>, %arg5: memref<1x32xf32, #tpu.memory_space<vmem>>, %arg6: memref<1x32xf32, #tpu.memory_space<vmem>>, %arg7: memref<1x32xf32, #tpu.memory_space<vmem>>, %arg8: memref<8x32xf32, #tpu.memory_space<vmem>>) attributes {dimension_semantics = [#tpu.dimension_semantics<parallel>], iteration_bounds = array<i64: 2>, scalar_prefetch = 0 : i64, scratch_operands = 0 : i64, tpu.core_type = #tpu.core_type<tc>, window_params = [{transform_indices = @transform_0, window_bounds = array<i64: 8, 32>}, {pipeline_mode = #tpu.pipeline_mode<synchronous>, transform_indices = @transform_1, window_bounds = array<i64: 32, 64>}, {pipeline_mode = #tpu.pipeline_mode<synchronous>, transform_indices = @transform_2, window_bounds = array<i64: 1, 64>}, {pipeline_mode = #tpu.pipeline_mode<synchronous>, transform_indices = @transform_3, window_bounds = array<i64: 64, 32>}, {pipeline_mode = #tpu.pipeline_mode<synchronous>, transform_indices = @transform_4, window_bounds = array<i64: 1, 32>}, {pipeline_mode = #tpu.pipeline_mode<synchronous>, transform_indices = @transform_5, window_bounds = array<i64: 1, 32>}, {pipeline_mode = #tpu.pipeline_mode<synchronous>, transform_indices = @transform_6, window_bounds = array<i64: 1, 32>}, {transform_indices = @transform_7, window_bounds = array<i64: 8, 32>}]} {
    %c0 = arith.constant 0 : index
    %c0_0 = arith.constant 0 : index
    %0 = vector.load %arg1[%c0, %c0_0] : memref<8x32xf32, #tpu.memory_space<vmem>>, vector<8x32xf32>
    %c0_1 = arith.constant 0 : index
    %c0_2 = arith.constant 0 : index
    %1 = vector.load %arg2[%c0_1, %c0_2] : memref<32x64xf32, #tpu.memory_space<vmem>>, vector<32x64xf32>
    %cst = arith.constant dense<0.000000e+00> : vector<8x64xf32>
    %2 = tpu.matmul %0, %1, %cst {dimension_numbers = #tpu.dot_dimension_numbers<[1], [0], [0], [1], [0, 0, 1, 1], [], []>} : vector<8x32xf32>, vector<32x64xf32>, vector<8x64xf32> -> vector<8x64xf32>
    %c0_3 = arith.constant 0 : index
    %c0_4 = arith.constant 0 : index
    %3 = vector.load %arg3[%c0_3, %c0_4] : memref<1x64xf32, #tpu.memory_space<vmem>>, vector<1x64xf32>
    %4 = vector.broadcast %3 : vector<1x64xf32> to vector<8x64xf32>
    %5 = arith.addf %2, %4 : vector<8x64xf32>
    %cst_5 = arith.constant 0.000000e+00 : f32
    %6 = vector.broadcast %cst_5 : f32 to vector<8x64xf32>
    %7 = arith.maximumf %5, %6 : vector<8x64xf32>
    %c0_6 = arith.constant 0 : index
    %c0_7 = arith.constant 0 : index
    %8 = vector.load %arg4[%c0_6, %c0_7] : memref<64x32xf32, #tpu.memory_space<vmem>>, vector<64x32xf32>
    %cst_8 = arith.constant dense<0.000000e+00> : vector<8x32xf32>
    %9 = tpu.matmul %7, %8, %cst_8 {dimension_numbers = #tpu.dot_dimension_numbers<[1], [0], [0], [1], [0, 0, 1, 1], [], []>} : vector<8x64xf32>, vector<64x32xf32>, vector<8x32xf32> -> vector<8x32xf32>
    %c0_9 = arith.constant 0 : index
    %c0_10 = arith.constant 0 : index
    %10 = vector.load %arg5[%c0_9, %c0_10] : memref<1x32xf32, #tpu.memory_space<vmem>>, vector<1x32xf32>
    %11 = vector.broadcast %10 : vector<1x32xf32> to vector<8x32xf32>
    %12 = arith.addf %9, %11 : vector<8x32xf32>
    %13 = arith.addf %12, %0 : vector<8x32xf32>
    %cst_11 = arith.constant dense<0.000000e+00> : vector<8xf32>
    %14 = vector.multi_reduction <add>, %13, %cst_11 [1] : vector<8x32xf32> to vector<8xf32>
    %15 = vector.shape_cast %14 : vector<8xf32> to vector<8x1xf32>
    %cst_12 = arith.constant 3.200000e+01 : f32
    %16 = vector.broadcast %cst_12 : f32 to vector<8x1xf32>
    %17 = arith.divf %15, %16 : vector<8x1xf32>
    %18 = vector.broadcast %17 : vector<8x1xf32> to vector<8x32xf32>
    %19 = arith.subf %13, %18 : vector<8x32xf32>
    %20 = arith.mulf %19, %19 : vector<8x32xf32>
    %cst_13 = arith.constant dense<0.000000e+00> : vector<8xf32>
    %21 = vector.multi_reduction <add>, %20, %cst_13 [1] : vector<8x32xf32> to vector<8xf32>
    %22 = vector.shape_cast %21 : vector<8xf32> to vector<8x1xf32>
    %cst_14 = arith.constant 3.200000e+01 : f32
    %23 = vector.broadcast %cst_14 : f32 to vector<8x1xf32>
    %24 = arith.divf %22, %23 : vector<8x1xf32>
    %cst_15 = arith.constant 9.99999974E-6 : f32
    %25 = vector.broadcast %cst_15 : f32 to vector<8x1xf32>
    %26 = arith.addf %24, %25 : vector<8x1xf32>
    %27 = math.rsqrt %26 : vector<8x1xf32>
    %28 = vector.broadcast %27 : vector<8x1xf32> to vector<8x32xf32>
    %29 = arith.mulf %19, %28 : vector<8x32xf32>
    %c0_16 = arith.constant 0 : index
    %c0_17 = arith.constant 0 : index
    %30 = vector.load %arg6[%c0_16, %c0_17] : memref<1x32xf32, #tpu.memory_space<vmem>>, vector<1x32xf32>
    %31 = vector.broadcast %30 : vector<1x32xf32> to vector<8x32xf32>
    %32 = arith.mulf %29, %31 : vector<8x32xf32>
    %c0_18 = arith.constant 0 : index
    %c0_19 = arith.constant 0 : index
    %33 = vector.load %arg7[%c0_18, %c0_19] : memref<1x32xf32, #tpu.memory_space<vmem>>, vector<1x32xf32>
    %34 = vector.broadcast %33 : vector<1x32xf32> to vector<8x32xf32>
    %35 = arith.addf %32, %34 : vector<8x32xf32>
    %c0_20 = arith.constant 0 : index
    %c0_21 = arith.constant 0 : index
    %36 = vector.load %arg8[%c0_20, %c0_21] : memref<8x32xf32, #tpu.memory_space<vmem>>, vector<8x32xf32>
    tpu.vector_store %arg8[%c0_20, %c0_21], %35 {strides = array<i32>} : memref<8x32xf32, #tpu.memory_space<vmem>>, vector<8x32xf32>,
    return
  }
  func.func @transform_0(%arg0: i32) -> (i32, i32) {
    %c0_i32 = arith.constant 0 : i32
    %c0_i32_0 = arith.constant 0 : i32
    return %arg0, %c0_i32 : i32, i32
  }
  func.func @transform_1(%arg0: i32) -> (i32, i32) {
    %c0_i32 = arith.constant 0 : i32
    %c0_i32_0 = arith.constant 0 : i32
    %c0_i32_1 = arith.constant 0 : i32
    return %c0_i32, %c0_i32_0 : i32, i32
  }
  func.func @transform_2(%arg0: i32) -> (i32, i32) {
    %c0_i32 = arith.constant 0 : i32
    %c0_i32_0 = arith.constant 0 : i32
    %c0_i32_1 = arith.constant 0 : i32
    return %c0_i32, %c0_i32_0 : i32, i32
  }
  func.func @transform_3(%arg0: i32) -> (i32, i32) {
    %c0_i32 = arith.constant 0 : i32
    %c0_i32_0 = arith.constant 0 : i32
    %c0_i32_1 = arith.constant 0 : i32
    return %c0_i32, %c0_i32_0 : i32, i32
  }
  func.func @transform_4(%arg0: i32) -> (i32, i32) {
    %c0_i32 = arith.constant 0 : i32
    %c0_i32_0 = arith.constant 0 : i32
    %c0_i32_1 = arith.constant 0 : i32
    return %c0_i32, %c0_i32_0 : i32, i32
  }
  func.func @transform_5(%arg0: i32) -> (i32, i32) {
    %c0_i32 = arith.constant 0 : i32
    %c0_i32_0 = arith.constant 0 : i32
    %c0_i32_1 = arith.constant 0 : i32
    return %c0_i32, %c0_i32_0 : i32, i32
  }
  func.func @transform_6(%arg0: i32) -> (i32, i32) {
    %c0_i32 = arith.constant 0 : i32
    %c0_i32_0 = arith.constant 0 : i32
    %c0_i32_1 = arith.constant 0 : i32
    return %c0_i32, %c0_i32_0 : i32, i32
  }
  func.func @transform_7(%arg0: i32) -> (i32, i32) {
    %c0_i32 = arith.constant 0 : i32
    %c0_i32_0 = arith.constant 0 : i32
    return %arg0, %c0_i32 : i32, i32
  }
}

</mosaic_0001>

<bundles_post_ra>
// kernel: positionwise_ffn.1
= control target key start
LH: loop header
LB: loop body
LE: loop exit
PB: predicated region body
PF: predicated region fallthrough
CT: control target
= control target key end

     0   :  { %12 = vsyncpa [#allocation3], 0  ;;  %s762_s0 = inlined_call_operand.vmem [shape: f32[16,32], index: 0, kind: input, shape index: {}]   ;;  %s763_s1 = inlined_call_operand.vmem [shape: f32[32,64], index: 1, kind: input, shape index: {}]   ;;  %s764_s2 = inlined_call_operand.vmem [shape: f32[1,64], index: 2, kind: input, shape index: {}]   ;;  %s765_s3 = inlined_call_operand.vmem [shape: f32[64,32], index: 3, kind: input, shape index: {}]   ;;  %s766_s4 = inlined_call_operand.vmem [shape: f32[1,32], index: 4, kind: input, shape index: {}]   ;;  %s767_s5 = inlined_call_operand.vmem [shape: f32[1,32], index: 5, kind: input, shape index: {}]   ;;  %s768_s6 = inlined_call_operand.vmem [shape: f32[1,32], index: 6, kind: input, shape index: {}]   ;;  %s769_s7 = inlined_call_operand.hbm [shape: f32[16,32], index: 7, kind: output, shape index: {}]  }
   0x1   :  { %14 = vsyncpa [#allocation3 + $0x1], 0  ;;  %s625_s24 = smov 0   ;;  %s627_s25 = smov 0  }
   0x2   :  { %s629_s26 = smov 0   ;;  %s631_s27 = smov 0  }
   0x3 LB: > { %s646_s28 = sadd.s32 4294967295, %s582_s27   ;;  %s460_s29 = sadd.s32 4294967294, %s582_s27   ;;  %s582_s27 = sphi %s631_s27, %s775_s27   ;;  %s578_s26 = sphi %s629_s26, %s774_s26   ;;  %s574_s25 = sphi %s627_s25, %s773_s25   ;;  %s570_s24 = sphi %s625_s24, %s772_s24  }
   0x4   : > { %s650_s30 = sadd.s32 1, %s582_s27   ;;  %s179_s8 = sadd.s32 1, %s578_s26 }
   0x5   : > { %s176_s9 = ssub.s32 %s582_s27, %s650_s30  ;;  %p189_p0 = scmp.ne.s32.totalorder %s578_s26, %s574_s25 }
   0x6   : > { %p177_p1 = scmp.eq.s32.totalorder %s176_s9, 0  ;;  %p190_p2 = scmp.eq.s32.totalorder %s646_s28, 1 }
   0x7   : > { %p195_p3 = scmp.ne.s32.totalorder %s574_s25, %s570_s24  ;;  %p196_p4 = scmp.eq.s32.totalorder %s460_s29, 1 }
   0x8   : > { %s661_s10 = scalar_select %p177_p1, %s578_s26, %s179_s8  }
   0x9   : > { %p663_p5 = por %p190_p2, %p189_p0  ;;  %p667_p6 = por %p196_p4, %p195_p3 }
   0xa   : > { %p463_p7 = scmp.ge.s32.totalorder %s582_s27, 1  ;;  %p239_p8 = scmp.lt.s32.totalorder %s582_s27, 3 }
   0xc   : > { %p240_p9 = pnand %p463_p7, %p239_p8 }
   0xd   : > { %p270_p10 = scmp.lt.s32.totalorder (!%p240_p9), %s646_s28, 1  ;;  %s267_s18 = sand.u32 (!%p240_p9), 1, %s574_s25  }
   0xe   : > { %243 = sbr.rel (%p240_p9) target bundleno = 558 (0x22e), region = 48  ;;  %s464_s19 = sshll.u32 (!%p240_p9), %s267_s18, 3 }
   0xf   : > { %s469_s20 = sshll.u32 (!%p240_p9), %s646_s28, 3  ;;  %s386_s16 = scalar_lea.sflag (!%p240_p9), [#allocation3], %s267_s18 }
  0x10   : > { %s396_s8 = scalar_lea.hbm (!%p240_p9), %s769_s7, %s469_s20 }
  0x11   : > { %s400_s15 = sshll.u32 (!%p240_p9), %s396_s8, 4  ;;  %s401_s15 = int_to_ptr.hbm [resolvable:$true] %s400_s15 }
  0x13   : > { %v278_v0 = vld [vmem:[%s763_s1 + $0x18] sm:$0xff]  ;;  %v277_v1 = vld [vmem:[%s763_s1 + $0x10] sm:$0xff]  ;;  %v276_v4 = vld [vmem:[%s763_s1 + $0x8] sm:$0xff]  ;;  %s271_s23 = scalar_select %p270_p10, %s646_s28, 1  ;;  %vm283_vm0 = vcmask 261120   ;;  %vm320_vm1 = vcmask 523264  }
  0x14   : > { %299 = vmatpush.msra.mxu0 %v278_v0  ;;  %v315_v2 = vld [vmem:[%s765_s3 + $0x38] sm:$0xff]  ;;  %v314_v3 = vld [vmem:[%s765_s3 + $0x30] sm:$0xff]  ;;  %v313_v5 = vld [vmem:[%s765_s3 + $0x28] sm:$0xff]  ;;  %v584_v22 = vmov 32.0  }
  0x15   : > { %332 = vmatpush.msra.mxu1 %v315_v2  ;;  %v275_v6 = vld [vmem:[%s763_s1] sm:$0xff]  ;;  %s465_s14 = sshll.u32 %s271_s23, 3  ;;  %v311_v9 = vld [vmem:[%s765_s3 + $0x18] sm:$0xff]  ;;  %v310_v10 = vld [vmem:[%s765_s3 + $0x10] sm:$0xff]  ;;  %516 = vrcp.f32 %v584_v22 }
  0x16   : > { %300 = vmatpush.msra.mxu0 %v277_v1  ;;  %s273_s17 = scalar_lea.vmem %s762_s0, %s465_s14  ;;  %v312_v7 = vld [vmem:[%s765_s3 + $0x20] sm:$0xff]  ;;  %v309_v11 = vld [vmem:[%s765_s3 + $0x8] sm:$0xff]  ;;  %s269_s14 = scalar_lea.vmem [#allocation2], %s464_s19 }
  0x17   : > { %333 = vmatpush.msra.mxu1 %v314_v3  ;;  %v274_v8 = vld [vmem:[%s273_s17] sm:$0xff]  ;;  %s398_s28 = sshll.u32 %s269_s14, 4  ;;  %s534_s17 = sshra.s32 %s401_s15, 4  ;;  %s399_s28 = int_to_ptr.vmem [resolvable:$true] %s398_s28  ;;  %s535_s17 = int_to_ptr.hbm [resolvable:$true] %s534_s17 }
  0x18   : > { %301 = vmatpush.msra.mxu0 %v276_v4  ;;  %v308_v12 = vld [vmem:[%s765_s3] sm:$0xff]  ;;  %s536_s20 = scalar_lea.hbm %s535_s17, 8  ;;  %s540_s19 = scalar_lea.hbm %s769_s7, 16 }
  0x19   : > { %334 = vmatpush.msra.mxu1 %v313_v5  ;;  %v512_v13 = vld [vmem:[%s764_s2] ss:$0 sm:$0xff]  ;;  %p537_p11 = scmp.ne.s32.totalorder %s535_s17, %s536_s20  ;;  %p541_p0 = scmp.lt.s32.totalorder %s535_s17, %s769_s7 }
  0x1a   : > { %302 = vmatpush.msra.mxu0 %v275_v6  ;;  %v513_v17 = vld [vmem:[%s766_s4] ss:$0 sm:$0xff]  ;;  %p542_p1 = scmp.lt.s32.totalorder %s540_s19, %s536_s20 }
  0x1b   : > { %466 = vmatmul.msk.f32.vlgmr.msra.gmra.mxu0 %vm283_vm0, %v274_v8  ;;  %335 = vmatpush.msra.mxu1 %v312_v7  ;;  %v517_v23 = vpop.eup %516  ;;  %v514_v43 = vld [vmem:[%s767_s5] ss:$0 sm:$0xff]  ;;  %p538_p12 = pnand %p537_p11, %p663_p5 }
  0x1c   : > { %v349_v24 = vmul.f32 32.0, %v517_v23  ;;  %vm353_vm2 = vweird.f32 %v517_v23  ;;  %v515_v46 = vld [vmem:[%s768_s6] ss:$0 sm:$0xff]  ;;  %p543_p2 = por %p542_p1, %p541_p0 }
  0x1d   : > { %336 = vmatpush.msra.mxu1 %v311_v9  ;;  %p539_p13 = pneg %p538_p12 }
  0x1e   : > { %v350_v25 = vsub.f32 1.0, %v349_v24 }
  0x1f   : > { %337 = vmatpush.msra.mxu1 %v310_v10  ;;  %p544_p3 = pnand %p543_p2, %p539_p13 }
  0x20   : > { %v351_v26 = vmul.f32 %v517_v23, %v350_v25 }
  0x21   : > { %338 = vmatpush.msra.mxu1 %v309_v11 }
  0x22   : > { %v352_v27 = vadd.f32 %v517_v23, %v351_v26 }
  0x23   : > { %339 = vmatpush.msra.mxu1 %v308_v12 }
  0x24   : > { %v354_v28 = vsel %vm353_vm2, %v517_v23, %v352_v27 }
  0x98   : > { %v304_v14 = vpop.f32.mrf.mxu0 }
  0x99   : > { %v305_v15 = vadd.f32 %v512_v13, %v304_v14 }
  0x9b   : > { %v307_v16 = vmax.f32 %v305_v15, 0.0 }
  0x9d   : > { %467 = vmatmul.msk.f32.vlgmr.msra.gmra.mxu1 %vm320_vm1, %v307_v16 }
 0x11a   : > { %v341_v18 = vpop.f32.mrf.mxu1 }
 0x11b   : > { %v342_v19 = vadd.f32 %v513_v17, %v341_v18 }
 0x11d   : > { %v344_v20 = vadd.f32 %v342_v19, %v274_v8 }
 0x11f   : > { %v345_v21 = vsel %vm283_vm0, %v344_v20, 0.0 }
 0x120   : > { %346 = vadd.xlane.f32.xlu0 %v345_v21 }
 0x193   : > { %v347_v29 = vpop.xlane.xlu0 %346 }
 0x194   : > { %v355_v30 = vmul.f32 %v354_v28, %v347_v29 }
 0x196   : > { %v356_v31 = vsub.f32 %v344_v20, %v355_v30 }
 0x198   : > { %v357_v32 = vmul.f32 %v356_v31, %v356_v31 }
 0x19a   : > { %v358_v33 = vsel %vm283_vm0, %v357_v32, 0.0 }
 0x19b   : > { %359 = vadd.xlane.f32.xlu0 %v358_v33 }
 0x20e   : > { %v360_v34 = vpop.xlane.xlu0 %359 }
 0x20f   : > { %v361_v35 = vmul.f32 %v360_v34, %v354_v28 }
 0x211   : > { %v362_v36 = vadd.f32 1e-05, %v361_v35 }
 0x213   : > { %518 = vrsqrt.f32 %v362_v36  ;;  %vm369_vm4 = vweird.f32 %v362_v36 }
 0x219   : > { %v519_v37 = vpop.eup %518 }
 0x21a   : > { %v364_v38 = vmul.f32 %v519_v37, %v362_v36  ;;  %vm370_vm3 = vweird.f32 %v519_v37 }
 0x21b   : > { %vm371_vm5 = vmor %vm369_vm4, %vm370_vm3 }
 0x21c   : > { %v365_v39 = vmul.f32 %v519_v37, %v364_v38 }
 0x21e   : > { %v366_v40 = vmul.f32 0.5, %v365_v39 }
 0x220   : > { %v367_v41 = vsub.f32 1.5, %v366_v40 }
 0x222   : > { %v368_v42 = vmul.f32 %v519_v37, %v367_v41 }
 0x224   : > { %v372_v44 = vsel %vm371_vm5, %v519_v37, %v368_v42 }
 0x225   : > { %v373_v45 = vmul.f32 %v372_v44, %v356_v31 }
 0x227   : > { %v378_v47 = vmul.f32 %v514_v43, %v373_v45 }
 0x229   : > { %v383_v48 = vadd.f32 %v515_v46, %v378_v47 }
 0x22b   : > { %384 = vst.msk [vmem:[%s269_s14] sm:$0xff] %vm283_vm0, %v383_v48 }
 0x22c   : > { %547 = shalt.err (!%p544_p3)
}
 0x22d   : > { %472 = dma.vmem_to_hbm [thread:$0]  (%p663_p5), %s399_s28, 128, %s401_s15, %s386_s16  }
 0x22e PF: > { %p478_p4 = scmp.ge.s32.totalorder %s582_s27, 2  ;;  %s412_s18 = sand.u32 1, %s570_s24  }
 0x22f   : > { %s413_s8 = scalar_lea.sflag [#allocation3], %s412_s18 }
 0x230   : > { %p475_p7 = pnand %p478_p4, %p667_p6 }
 0x232   : > { %p476_p8 = pneg %p475_p7 }
 0x234   : > { %565 = dma.done.wait (%p476_p8), %s413_s8, 128  }
 0x235   : > { %567 = vsyncadd (%p476_p8), %s413_s8, 4294967168  ;;  %p17_p9 = scmp.ge.s32.totalorder %s650_s30, 4   ;;  %s772_s24 = smov %s574_s25 }
 0x236   : > { %s773_s25 = smov %s578_s26  ;;  %s774_s26 = smov %s661_s10 }
 0x237   : > { %s775_s27 = smov %s650_s30  ;;  %19 = sbr.rel (!%p17_p9) target bundleno = 3 (0x3), region = 83 }
 0x23c   :  { %419 = vsyncpa [#allocation3], 1 }
 0x23d   :  { %421 = vsyncpa [#allocation3 + $0x1], 1 }

</bundles_post_ra>
